<compile_context>
chip_gen: v7x
topology: tpu7x:2x2x1
jax: 0.10.0
libtpu: 0.0.40
codegen_flags: <defaults>
</compile_context>

<pallas_src>
import jax
import jax.numpy as jnp
from jax.experimental import pallas as pl
from jax.experimental.pallas import tpu as pltpu

# ---------------- configuration (small synthetic network) ----------------
B = 128                       # batch (multiple of 8 sublanes; grid-parallel)
TB = 64                       # batch tile per grid step
OBS = 32                      # vector observation size
H = 64                        # network_settings.hidden_units
HP = 128                      # hidden width padded to a full lane tile
A = 5                         # discrete_branches = (5,) -> output_act_size = 5
STREAMS = ("extrinsic", "curiosity")   # stream_names (2 reward streams)
NUM_OBS_INPUTS = 1            # len(inputs) -> shape of the random action
MODEL_EXPORT_VERSION = 3.0
MEMORY_SIZE = 0.0             # no LSTM in network_settings

W_ROWS = OBS + 2 * HP         # packed weight slab rows: w1 | w2 | fused heads


# ---------------- Pallas kernel: encoder + fused heads + greedy argmax ----
def _qnet_kernel(obs_ref, w_ref, b_ref, out_ref):
    # Observations: f32 in HBM/VMEM, cast to bf16 only for the MXU operand.
    x = obs_ref[...].astype(jnp.bfloat16)

    # Static sublane-aligned views into the packed bf16 weight slab.
    w1 = w_ref[0:OBS, :]                      # (OBS, HP)   cols >= H are 0
    w2 = w_ref[OBS:OBS + HP, :]               # (HP, HP)    rows/cols >= H are 0
    wh = w_ref[OBS + HP:OBS + 2 * HP, :]      # (HP, HP)    cols >= 2A are 0

    b1 = b_ref[0:1, :]                        # (1, HP) f32, zero padded
    b2 = b_ref[1:2, :]
    bh = b_ref[2:3, :]

    # LinearEncoder layer 1: Linear + Swish (bf16 MXU, f32 accumulate/VPU).
    h = jnp.dot(x, w1, preferred_element_type=jnp.float32) + b1
    h = h * jax.nn.sigmoid(h)                 # padded lanes stay exactly 0

    # LinearEncoder layer 2: Linear + Swish.
    h = jnp.dot(h.astype(jnp.bfloat16), w2,
                preferred_element_type=jnp.float32) + b2
    h = h * jax.nn.sigmoid(h)

    # Fused ValueHeads: one GEMM, q[:, :A] = stream0, q[:, A:2A] = stream1.
    q = jnp.dot(h.astype(jnp.bfloat16), wh,
                preferred_element_type=jnp.float32) + bh   # (TB, HP) f32

    # get_greedy_action: argmax over the action dim of the per-stream sum,
    # first-occurrence tie-break (matches torch.argmax), all in f32/int32.
    qsum = q[:, 0:A] + q[:, A:2 * A]                        # (TB, A)
    idx = jax.lax.broadcasted_iota(jnp.int32, qsum.shape, 1)
    maxv = jnp.max(qsum, axis=1, keepdims=True)
    act = jnp.min(jnp.where(qsum == maxv, idx, A), axis=1, keepdims=True)

    # Pack everything into one lane-dense output slab:
    #   lanes [0, 2A) = q-values, lane 2A = greedy index encoded as f32.
    lane = jax.lax.broadcasted_iota(jnp.int32, q.shape, 1)
    out_ref[...] = jnp.where(lane == 2 * A, act.astype(jnp.float32), q)


def qnetwork_body(obs, params):
    """Runs the Pallas kernel. Returns (q_extrinsic, q_curiosity, greedy)."""
    assert obs.shape == (B, OBS) and B % TB == 0

    cost = pl.CostEstimate(
        flops=2 * B * (OBS * HP + HP * HP + HP * HP),
        transcendentals=B * 2 * HP,
        bytes_accessed=(B * OBS * 4) + (W_ROWS * HP * 2) + (3 * HP * 4)
                       + (B * HP * 4),
    )

    out = pl.pallas_call(
        _qnet_kernel,
        out_shape=jax.ShapeDtypeStruct((B, HP), jnp.float32),
        grid_spec=pltpu.PrefetchScalarGridSpec(
            num_scalar_prefetch=0,
            grid=(B // TB,),
            in_specs=[
                pl.BlockSpec((TB, OBS), lambda i: (i, 0)),      # obs tile
                pl.BlockSpec((W_ROWS, HP), lambda i: (0, 0)),   # weight slab
                pl.BlockSpec((3, HP), lambda i: (0, 0)),        # bias slab
            ],
            out_specs=pl.BlockSpec((TB, HP), lambda i: (i, 0)),
        ),
        compiler_params=pltpu.CompilerParams(
            dimension_semantics=("parallel",)),
        cost_estimate=cost,
    )(obs, params["w_slab"], params["b_slab"])

    q0 = out[:, 0:A]                               # extrinsic stream
    q1 = out[:, A:2 * A]                           # curiosity stream
    greedy = out[:, 2 * A:2 * A + 1].astype(jnp.int32)
    return q0, q1, greedy


def qnetwork_forward(inputs, params, key):
    """Mirrors QNetwork.forward: returns the export tuple."""
    obs = inputs[0]
    q0, q1, greedy = qnetwork_body(obs, params)

    version_number = jnp.array([MODEL_EXPORT_VERSION], dtype=jnp.float32)
    memory_size_vector = jnp.array([MEMORY_SIZE], dtype=jnp.float32)
    discrete_act_size_vector = jnp.array([[float(A)]], dtype=jnp.float32)

    # get_random_action: torch.randint(0, branches[0], (len(inputs), 1)).
    # TODO(synk): torch's global RNG has no Pallas equivalent; plain-JAX glue.
    random_action = jax.random.randint(
        key, (NUM_OBS_INPUTS, 1), 0, A, dtype=jnp.int32)

    # Names follow the (buggy but faithful) original export code:
    #   disc_action_out               = greedy action
    #   deterministic_disc_action_out = random action
    return (version_number, memory_size_vector, greedy,
            discrete_act_size_vector, random_action), (q0, q1)


# ---------------- parameter init & packing -------------------------------
def init_params(key):
    ks = jax.random.split(key, 8)

    def dense(kw, fan_in, fan_out):
        scale = (2.0 / fan_in) ** 0.5
        return jax.random.normal(kw, (fan_in, fan_out), jnp.float32) * scale

    w1 = dense(ks[0], OBS, H)
    w2 = dense(ks[1], H, H)
    wh0 = dense(ks[2], H, A)
    wh1 = dense(ks[3], H, A)
    b1 = jax.random.normal(ks[4], (H,), jnp.float32) * 0.1
    b2 = jax.random.normal(ks[5], (H,), jnp.float32) * 0.1
    bh0 = jax.random.normal(ks[6], (A,), jnp.float32) * 0.1
    bh1 = jax.random.normal(ks[7], (A,), jnp.float32) * 0.1

    # Zero-pad each layer to 128 lanes and stack into one bf16 slab
    # (w1 rows [0,OBS), w2 rows [OBS,OBS+HP), fused heads rows [OBS+HP, ...)).
    w1p = jnp.zeros((OBS, HP), jnp.float32).at[:, :H].set(w1)
    w2p = jnp.zeros((HP, HP), jnp.float32).at[:H, :H].set(w2)
    whp = (jnp.zeros((HP, HP), jnp.float32)
           .at[:H, :A].set(wh0)
           .at[:H, A:2 * A].set(wh1))
    w_slab = jnp.concatenate([w1p, w2p, whp], axis=0).astype(jnp.bfloat16)

    b_slab = (jnp.zeros((3, HP), jnp.float32)
              .at[0, :H].set(b1)
              .at[1, :H].set(b2)
              .at[2, :A].set(bh0)
              .at[2, A:2 * A].set(bh1))

    return {
        "w_slab": w_slab, "b_slab": b_slab,
        # f32 originals kept only for the reference check in __main__.
        "w1": w1, "w2": w2, "wh0": wh0, "wh1": wh1,
        "b1": b1, "b2": b2, "bh0": bh0, "bh1": bh1,
    }


def _reference_q(obs, p):
    """Pure-JAX f32 reference using the bf16-quantized weights."""
    deq = lambda w: w.astype(jnp.bfloat16).astype(jnp.float32)
    h = obs @ deq(p["w1"]) + p["b1"]
    h = h * jax.nn.sigmoid(h)
    h = h @ deq(p["w2"]) + p["b2"]
    h = h * jax.nn.sigmoid(h)
    q0 = h @ deq(p["wh0"]) + p["bh0"]
    q1 = h @ deq(p["wh1"]) + p["bh1"]
    return q0, q1


if __name__ == "__main__":
    root = jax.random.PRNGKey(0)
    k_params, k_obs, k_rand = jax.random.split(root, 3)

    params = init_params(k_params)
    obs = jax.random.normal(k_obs, (B, OBS), jnp.float32)
    inputs = [obs]   # List[Tensor] of observations (one vector-obs spec)

    export, (q0, q1) = qnetwork_forward(inputs, params, k_rand)
    export = jax.block_until_ready(export)
    q0, q1 = jax.block_until_ready((q0, q1))

    version, mem_size, greedy, act_size_vec, rand_act = export
    assert version.shape == (1,)
    assert mem_size.shape == (1,)
    assert greedy.shape == (B, 1) and greedy.dtype == jnp.int32
    assert act_size_vec.shape == (1, 1)
    assert rand_act.shape == (NUM_OBS_INPUTS, 1)
    assert bool(jnp.all((greedy >= 0) & (greedy < A)))

    # Numerical check vs. pure-JAX reference (bf16 weights, f32 activations
    # in the reference vs. bf16 MXU operands in the kernel -> loose tolerance).
    r0, r1 = _reference_q(obs, params)
    assert bool(jnp.allclose(q0, r0, atol=5e-2, rtol=5e-2))
    assert bool(jnp.allclose(q1, r1, atol=5e-2, rtol=5e-2))

    # Greedy action must be exactly consistent with the kernel's own q-values
    # (first-occurrence tie-break, matching torch.argmax).
    ref_greedy = jnp.argmax(q0 + q1, axis=1)
    assert bool(jnp.all(greedy[:, 0] == ref_greedy))

    print("KERNEL_OK")
</pallas_src>

<mosaic_0001>
module attributes {stable_mosaic.version = 11 : i64} {
  func.func @_qnet_kernel(%arg0: i32, %arg1: memref<64x32xf32, #tpu.memory_space<vmem>>, %arg2: memref<288x128xbf16, #tpu.memory_space<vmem>>, %arg3: memref<3x128xf32, #tpu.memory_space<vmem>>, %arg4: memref<64x128xf32, #tpu.memory_space<vmem>>) attributes {dimension_semantics = [#tpu.dimension_semantics<parallel>], iteration_bounds = array<i64: 2>, scalar_prefetch = 0 : i64, scratch_operands = 0 : i64, tpu.core_type = #tpu.core_type<tc>, window_params = [{transform_indices = @transform_0, window_bounds = array<i64: 64, 32>}, {pipeline_mode = #tpu.pipeline_mode<synchronous>, transform_indices = @transform_1, window_bounds = array<i64: 288, 128>}, {pipeline_mode = #tpu.pipeline_mode<synchronous>, transform_indices = @transform_2, window_bounds = array<i64: 3, 128>}, {transform_indices = @transform_3, window_bounds = array<i64: 64, 128>}]} {
    %c0 = arith.constant 0 : index
    %c0_0 = arith.constant 0 : index
    %0 = vector.load %arg1[%c0, %c0_0] : memref<64x32xf32, #tpu.memory_space<vmem>>, vector<64x32xf32>
    %1 = arith.truncf %0 : vector<64x32xf32> to vector<64x32xbf16>
    %c0_1 = arith.constant 0 : index
    %c0_2 = arith.constant 0 : index
    %2 = vector.load %arg2[%c0_1, %c0_2] : memref<288x128xbf16, #tpu.memory_space<vmem>>, vector<32x128xbf16>
    %c32 = arith.constant 32 : index
    %c0_3 = arith.constant 0 : index
    %3 = vector.load %arg2[%c32, %c0_3] : memref<288x128xbf16, #tpu.memory_space<vmem>>, vector<128x128xbf16>
    %c160 = arith.constant 160 : index
    %c0_4 = arith.constant 0 : index
    %4 = vector.load %arg2[%c160, %c0_4] : memref<288x128xbf16, #tpu.memory_space<vmem>>, vector<128x128xbf16>
    %c0_5 = arith.constant 0 : index
    %c0_6 = arith.constant 0 : index
    %5 = vector.load %arg3[%c0_5, %c0_6] : memref<3x128xf32, #tpu.memory_space<vmem>>, vector<1x128xf32>
    %c1 = arith.constant 1 : index
    %c0_7 = arith.constant 0 : index
    %6 = vector.load %arg3[%c1, %c0_7] : memref<3x128xf32, #tpu.memory_space<vmem>>, vector<1x128xf32>
    %c2 = arith.constant 2 : index
    %c0_8 = arith.constant 0 : index
    %7 = vector.load %arg3[%c2, %c0_8] : memref<3x128xf32, #tpu.memory_space<vmem>>, vector<1x128xf32>
    %cst = arith.constant dense<0.000000e+00> : vector<64x128xf32>
    %8 = tpu.matmul %1, %2, %cst {dimension_numbers = #tpu.dot_dimension_numbers<[1], [0], [0], [1], [0, 0, 1, 1], [], []>} : vector<64x32xbf16>, vector<32x128xbf16>, vector<64x128xf32> -> vector<64x128xf32>
    %9 = vector.broadcast %5 : vector<1x128xf32> to vector<64x128xf32>
    %10 = arith.addf %8, %9 : vector<64x128xf32>
    %11 = arith.negf %10 : vector<64x128xf32>
    %12 = math.exp %11 : vector<64x128xf32>
    %cst_9 = arith.constant 1.000000e+00 : f32
    %13 = vector.broadcast %cst_9 : f32 to vector<64x128xf32>
    %14 = arith.addf %13, %12 : vector<64x128xf32>
    %15 = arith.divf %13, %14 : vector<64x128xf32>
    %16 = arith.mulf %10, %15 : vector<64x128xf32>
    %17 = arith.truncf %16 : vector<64x128xf32> to vector<64x128xbf16>
    %cst_10 = arith.constant dense<0.000000e+00> : vector<64x128xf32>
    %18 = tpu.matmul %17, %3, %cst_10 {dimension_numbers = #tpu.dot_dimension_numbers<[1], [0], [0], [1], [0, 0, 1, 1], [], []>} : vector<64x128xbf16>, vector<128x128xbf16>, vector<64x128xf32> -> vector<64x128xf32>
    %19 = vector.broadcast %6 : vector<1x128xf32> to vector<64x128xf32>
    %20 = arith.addf %18, %19 : vector<64x128xf32>
    %21 = arith.negf %20 : vector<64x128xf32>
    %22 = math.exp %21 : vector<64x128xf32>
    %cst_11 = arith.constant 1.000000e+00 : f32
    %23 = vector.broadcast %cst_11 : f32 to vector<64x128xf32>
    %24 = arith.addf %23, %22 : vector<64x128xf32>
    %25 = arith.divf %23, %24 : vector<64x128xf32>
    %26 = arith.mulf %20, %25 : vector<64x128xf32>
    %27 = arith.truncf %26 : vector<64x128xf32> to vector<64x128xbf16>
    %cst_12 = arith.constant dense<0.000000e+00> : vector<64x128xf32>
    %28 = tpu.matmul %27, %4, %cst_12 {dimension_numbers = #tpu.dot_dimension_numbers<[1], [0], [0], [1], [0, 0, 1, 1], [], []>} : vector<64x128xbf16>, vector<128x128xbf16>, vector<64x128xf32> -> vector<64x128xf32>
    %29 = vector.broadcast %7 : vector<1x128xf32> to vector<64x128xf32>
    %30 = arith.addf %28, %29 : vector<64x128xf32>
    %31 = vector.extract_strided_slice %30 {offsets = [0, 0], sizes = [64, 5], strides = [1, 1]} : vector<64x128xf32> to vector<64x5xf32>
    %32 = vector.extract_strided_slice %30 {offsets = [0, 5], sizes = [64, 5], strides = [1, 1]} : vector<64x128xf32> to vector<64x5xf32>
    %33 = arith.addf %31, %32 : vector<64x5xf32>
    %34 = tpu.iota {dimensions = array<i32: 1>} : vector<64x5xi32>
    %cst_13 = arith.constant dense<0xFF800000> : vector<64xf32>
    %35 = vector.multi_reduction <maximumf>, %33, %cst_13 [1] : vector<64x5xf32> to vector<64xf32>
    %36 = vector.shape_cast %35 : vector<64xf32> to vector<64x1xf32>
    %37 = vector.broadcast %36 : vector<64x1xf32> to vector<64x5xf32>
    %38 = arith.cmpf oeq, %33, %37 : vector<64x5xf32>
    %c5_i32 = arith.constant 5 : i32
    %39 = vector.broadcast %c5_i32 : i32 to vector<64x5xi32>
    %40 = arith.select %38, %34, %39 : vector<64x5xi1>, vector<64x5xi32>
    %cst_14 = arith.constant dense<2147483647> : vector<64xi32>
    %41 = vector.multi_reduction <minsi>, %40, %cst_14 [1] : vector<64x5xi32> to vector<64xi32>
    %42 = vector.shape_cast %41 : vector<64xi32> to vector<64x1xi32>
    %43 = tpu.iota {dimensions = array<i32: 1>} : vector<64x128xi32>
    %c10_i32 = arith.constant 10 : i32
    %44 = vector.broadcast %c10_i32 : i32 to vector<64x128xi32>
    %45 = arith.cmpi eq, %43, %44 : vector<64x128xi32>
    %46 = arith.sitofp %42 : vector<64x1xi32> to vector<64x1xf32>
    %47 = vector.shape_cast %46 : vector<64x1xf32> to vector<64x1xf32>
    %48 = vector.broadcast %47 : vector<64x1xf32> to vector<64x128xf32>
    %49 = arith.select %45, %48, %30 : vector<64x128xi1>, vector<64x128xf32>
    %c0_15 = arith.constant 0 : index
    %c0_16 = arith.constant 0 : index
    %50 = vector.load %arg4[%c0_15, %c0_16] : memref<64x128xf32, #tpu.memory_space<vmem>>, vector<64x128xf32>
    tpu.vector_store %arg4[%c0_15, %c0_16], %49 {strides = array<i32>} : memref<64x128xf32, #tpu.memory_space<vmem>>, vector<64x128xf32>,
    return
  }
  func.func @transform_0(%arg0: i32) -> (i32, i32) {
    %c0_i32 = arith.constant 0 : i32
    %c0_i32_0 = arith.constant 0 : i32
    return %arg0, %c0_i32 : i32, i32
  }
  func.func @transform_1(%arg0: i32) -> (i32, i32) {
    %c0_i32 = arith.constant 0 : i32
    %c0_i32_0 = arith.constant 0 : i32
    %c0_i32_1 = arith.constant 0 : i32
    return %c0_i32, %c0_i32_0 : i32, i32
  }
  func.func @transform_2(%arg0: i32) -> (i32, i32) {
    %c0_i32 = arith.constant 0 : i32
    %c0_i32_0 = arith.constant 0 : i32
    %c0_i32_1 = arith.constant 0 : i32
    return %c0_i32, %c0_i32_0 : i32, i32
  }
  func.func @transform_3(%arg0: i32) -> (i32, i32) {
    %c0_i32 = arith.constant 0 : i32
    %c0_i32_0 = arith.constant 0 : i32
    return %arg0, %c0_i32 : i32, i32
  }
}

</mosaic_0001>

<bundles_post_ra>
// kernel: tpu_custom_call.1
= control target key start
LH: loop header
LB: loop body
LE: loop exit
PB: predicated region body
PF: predicated region fallthrough
CT: control target
= control target key end

     0   :  { %8 = vsyncpa [#allocation3], 0  ;;  %s1599_s0 = inlined_call_operand.vmem [shape: f32[128,32], index: 0, kind: input, shape index: {}]   ;;  %s1600_s1 = inlined_call_operand.vmem [shape: bf16[288,128], index: 1, kind: input, shape index: {}]   ;;  %s1601_s2 = inlined_call_operand.vmem [shape: f32[3,128], index: 2, kind: input, shape index: {}]   ;;  %s1602_s3 = inlined_call_operand.hbm [shape: f32[128,128], index: 3, kind: output, shape index: {}]  }
   0x1   :  { %10 = vsyncpa [#allocation3 + $0x1], 0  ;;  %s1332_s12 = smov 0   ;;  %s1334_s13 = smov 0  }
   0x2   :  { %s1336_s14 = smov 0   ;;  %s1338_s15 = smov 0  }
   0x3 LB: > { %s1353_s16 = sadd.s32 4294967295, %s1306_s15   ;;  %s976_s17 = sadd.s32 4294967294, %s1306_s15   ;;  %s1306_s15 = sphi %s1338_s15, %s1608_s15   ;;  %s1302_s14 = sphi %s1336_s14, %s1607_s14   ;;  %s1298_s13 = sphi %s1334_s13, %s1606_s13   ;;  %s1294_s12 = sphi %s1332_s12, %s1605_s12  }
   0x4   : > { %s1357_s18 = sadd.s32 1, %s1306_s15   ;;  %s91_s19 = sadd.s32 1, %s1302_s14 }
   0x5   : > { %s88_s20 = ssub.s32 %s1306_s15, %s1357_s18  ;;  %p101_p0 = scmp.ne.s32.totalorder %s1302_s14, %s1298_s13 }
   0x6   : > { %p89_p1 = scmp.eq.s32.totalorder %s88_s20, 0  ;;  %p102_p2 = scmp.eq.s32.totalorder %s1353_s16, 1 }
   0x7   : > { %p107_p3 = scmp.ne.s32.totalorder %s1298_s13, %s1294_s12  ;;  %p108_p4 = scmp.eq.s32.totalorder %s976_s17, 1 }
   0x8   : > { %s1368_s21 = scalar_select %p89_p1, %s1302_s14, %s91_s19  }
   0x9   : > { %p1370_p5 = por %p102_p2, %p101_p0  ;;  %p1374_p6 = por %p108_p4, %p107_p3 }
   0xa   : > { %p979_p7 = scmp.ge.s32.totalorder %s1306_s15, 1  ;;  %p141_p8 = scmp.lt.s32.totalorder %s1306_s15, 3 }
   0xc   : > { %p142_p9 = pnand %p979_p7, %p141_p8 }
   0xd   : > { %v1162_v0 = vld [vmem:[%s1600_s1] sm:$0xff] (!%p142_p9)   ;;  %s981_s26 = sshll.u32 (!%p142_p9), %s1353_s16, 3  ;;  %v1163_v1 = vld [vmem:[%s1600_s1 + $0x8] sm:$0xff] (!%p142_p9)   ;;  %vm240_vm0 = vcmask (!%p142_p9), 261120   ;;  %v1164_v14 = vld [vmem:[%s1600_s1 + $0x10] sm:$0xff] (!%p142_p9)   ;;  %s1308_s8 = smov (!%p142_p9), 123  }
   0xe   : > { %145 = sbr.rel (%p142_p9) target bundleno = 1333 (0x535), region = 32  ;;  %p166_p10 = scmp.lt.s32.totalorder (!%p142_p9), %s981_s26, 15  ;;  %1060 = vmatprep.subr.bf16.mxu0 (!%p142_p9), %v1162_v0  ;;  %1072 = vmatprep.subr.bf16.mxu1 (!%p142_p9), %v1164_v14  ;;  %v1165_v15 = vld [vmem:[%s1600_s1 + $0x18] sm:$0xff] (!%p142_p9)   ;;  %v1166_v16 = vld [vmem:[%s1600_s1 + $0x20] sm:$0xff] (!%p142_p9)   ;;  %v1167_v17 = vld [vmem:[%s1600_s1 + $0x28] sm:$0xff] (!%p142_p9)   ;;  %vm714_vm1 = vcmask (!%p142_p9), 39936  }
   0xf   : > { %1061 = vmatpush3.bf16.msra.mxu0 (!%p142_p9), %v1162_v0  ;;  %1073 = vmatpush3.bf16.msra.mxu1 (!%p142_p9), %v1164_v14  ;;  %v1168_v18 = vld [vmem:[%s1600_s1 + $0x30] sm:$0xff] (!%p142_p9)   ;;  %v1169_v19 = vld [vmem:[%s1600_s1 + $0x38] sm:$0xff] (!%p142_p9)   ;;  %v1170_v20 = vld [vmem:[%s1600_s1 + $0x40] sm:$0xff] (!%p142_p9)   ;;  %s162_s9 = sand.u32 (!%p142_p9), 1, %s1298_s13   ;;  %s1029_s17 = sshll.u32 (!%p142_p9), %s1353_s16, 10 }
  0x10   : > { %1062 = vmatprep.subr.bf16.mxu0 (!%p142_p9), %v1163_v1  ;;  %1074 = vmatprep.subr.bf16.mxu1 (!%p142_p9), %v1165_v15  ;;  %v1171_v21 = vld [vmem:[%s1600_s1 + $0x48] sm:$0xff] (!%p142_p9)   ;;  %v983_v22 = vld [vmem:[%s1601_s2] ss:$0 sm:$0xff] (!%p142_p9)  ;;  %s980_s10 = sshll.u32 (!%p142_p9), %s162_s9, 6  ;;  %s1548_s25 = scalar_lea.hbm (!%p142_p9), %s1602_s3, %s1029_s17 }
  0x11   : > { %s1515_s11 = scalar_lea.vmem (!%p142_p9), [#allocation2], %s980_s10  ;;  %s1558_s16 = scalar_lea.sflag (!%p142_p9), [#allocation3], %s162_s9 }
  0x12   : > { %s914_s19 = sshll.u32 (!%p142_p9), %s1515_s11, 4  ;;  %s1309_s27 = smov (!%p142_p9), [#allocation2]   ;;  %s1550_s19 = int_to_ptr.vmem [resolvable:$true] %s914_s19 }
  0x13   : > { %1063 = vmatpush3.bf16.msra.mxu0 (!%p142_p9), %v1163_v1  ;;  %1075 = vmatpush3.bf16.msra.mxu1 (!%p142_p9), %v1165_v15  ;;  %s1248_s28 = sshll.u32 (!%p142_p9), %s1309_s27, 4  ;;  %s1249_s28 = int_to_ptr.vmem [resolvable:$false] %s1248_s28 }
  0x14   : > { %1076 = vmatprep.subr.bf16.mxu1 (!%p142_p9), %v1166_v16  ;;  %p1251_p0 = scmp.lt.s32.totalorder (!%p142_p9), %s1550_s19, %s1249_s28 }
  0x15   : > { %s1610_s26 = smov (!%p166_p10, %s981_s26), 15 }
  0x16   : > { %s982_s29 = sshll.u32 %s1610_s26, 3  ;;  %s1244_s26 = scalar_lea.vmem %s1550_s19, 1024 }
  0x17   : > { %s169_s5 = scalar_lea.vmem %s1599_s0, %s982_s29  ;;  %1077 = vmatpush3.bf16.msra.mxu1 %v1166_v16  ;;  %p1245_p11 = scmp.ne.s32.totalorder %s1550_s19, %s1244_s26 }
  0x18   : > { %v173_v2 = vld [vmem:[%s169_s5] sm:$0xff]  ;;  %v174_v3 = vld [vmem:[%s169_s5 + $0x8] sm:$0xff]  ;;  %v175_v4 = vld [vmem:[%s169_s5 + $0x10] sm:$0xff]  ;;  %1078 = vmatprep.subr.bf16.mxu1 %v1167_v17  ;;  %s1250_s29 = scalar_lea.vmem %s1249_s28, 2048 }
  0x19   : > { %v181_v5 = vpack.c.bf16 %v174_v3, %v173_v2  ;;  %v176_v6 = vld [vmem:[%s169_s5 + $0x18] sm:$0xff]  ;;  %v177_v7 = vld [vmem:[%s169_s5 + $0x20] sm:$0xff]  ;;  %v178_v8 = vld [vmem:[%s169_s5 + $0x28] sm:$0xff]  ;;  %p1246_p12 = pnand %p1245_p11, %p1370_p5  ;;  %p1252_p1 = scmp.lt.s32.totalorder %s1250_s29, %s1244_s26 }
  0x1a   : > { %v182_v9 = vpack.c.bf16 %v176_v6, %v175_v4  ;;  %v183_v10 = vpack.c.bf16 %v178_v8, %v177_v7  ;;  %v179_v11 = vld [vmem:[%s169_s5 + $0x30] sm:$0xff]  ;;  %v180_v12 = vld [vmem:[%s169_s5 + $0x38] sm:$0xff] }
  0x1b   : > { %1064 = vmatprep.mubr.msk.bf16.mxu0 %vm240_vm0, %v181_v5  ;;  %v184_v13 = vpack.c.bf16 %v180_v12, %v179_v11  ;;  %1079 = vmatpush3.bf16.msra.mxu1 %v1167_v17  ;;  %p1247_p13 = pneg %p1246_p12  ;;  %p1253_p2 = por %p1252_p1, %p1251_p0 }
  0x1c   : > { %1065 = vmatmul.mubr.msk.bf16.vlgmr.msra.gmra.mrb[0].mxu0 %vm240_vm0, %v182_v9  ;;  %1080 = vmatprep.subr.bf16.mxu1 %v1168_v18 }
  0x1d   : > { %1068 = vmatprep.mubr.msk.bf16.mxu0 %vm240_vm0, %v183_v10  ;;  %p1254_p3 = pnand %p1253_p2, %p1247_p13 }
  0x1f   : > { %1081 = vmatpush3.bf16.msra.mxu1 %v1168_v18 }
  0x20   : > { %1082 = vmatprep.subr.bf16.mxu1 %v1169_v19 }
  0x23   : > { %1083 = vmatpush3.bf16.msra.mxu1 %v1169_v19  ;;  %v1172_v19 = vld [vmem:[%s1600_s1 + $0x50] sm:$0xff]  }
  0x24   : > { %1069 = vmatmul.mubr.msk.bf16.gmra.mrb[4].mxu0 %vm240_vm0, %v184_v13  ;;  %1084 = vmatprep.subr.bf16.mxu1 %v1170_v20 }
  0x25   : > { %1096 = vmatprep.subr.bf16.mxu0 %v1172_v19 }
  0x26   : > { %1097 = vmatpush3.bf16.msra.mxu0 %v1172_v19 }
  0x27   : > { %1085 = vmatpush3.bf16.msra.mxu1 %v1170_v20  ;;  %v1173_v20 = vld [vmem:[%s1600_s1 + $0x58] sm:$0xff]  }
  0x28   : > { %1086 = vmatprep.subr.bf16.mxu1 %v1171_v21  ;;  %1098 = vmatprep.subr.bf16.mxu0 %v1173_v20 }
  0x2a   : > { %1099 = vmatpush3.bf16.msra.mxu0 %v1173_v20 }
  0x2b   : > { %1087 = vmatpush3.bf16.msra.mxu1 %v1171_v21  ;;  %v1174_v21 = vld [vmem:[%s1600_s1 + $0x60] sm:$0xff]  }
  0x2c   : > { %1100 = vmatprep.subr.bf16.mxu0 %v1174_v21 }
  0x2e   : > { %1101 = vmatpush3.bf16.msra.mxu0 %v1174_v21 }
  0xef   : > { %v1066_v23 = vpop.f32.mrb[0].mxu0 }
  0xf0   : > { %v296_v24 = vadd.f32 %v1066_v23, %v983_v22  ;;  %v287_v25 = vpop.f32.mrb[1].mxu0  ;;  %v1176_v23 = vld [vmem:[%s1600_s1 + $0x70] sm:$0xff]  }
  0xf1   : > { %v288_v26 = vadd.f32 %v983_v22, %v287_v25  ;;  %v1067_v27 = vpop.f32.mrb[2].mxu0  ;;  %v1178_v25 = vld [vmem:[%s1600_s1 + $0x80] sm:$0xff]  }
  0xf2   : > { %v992_v28 = vmul.f32 -1.442695, %v296_v24  ;;  %v299_v29 = vadd.f32 %v1067_v27, %v983_v22  ;;  %v290_v30 = vpop.f32.mrb[3].mxu0  ;;  %v998_v27 = vld [vmem:[%s1601_s2 + $0x1] ss:$0 sm:$0xff] }
  0xf3   : > { %v990_v31 = vmul.f32 -1.442695, %v288_v26  ;;  %v291_v32 = vadd.f32 %v983_v22, %v290_v30 }
  0xf4   : > { %1180 = vpow2.f32 %v992_v28  ;;  %v993_v33 = vmul.f32 -1.442695, %v299_v29 }
  0xf5   : > { %1182 = vpow2.f32 %v990_v31  ;;  %v991_v34 = vmul.f32 -1.442695, %v291_v32 }
  0xf6   : > { %1184 = vpow2.f32 %v993_v33 }
  0xf7   : > { %1186 = vpow2.f32 %v991_v34  ;;  %v1070_v35 = vpop.f32.mrb[4].mxu0 }
  0xf8   : > { %v312_v36 = vadd.f32 %v1070_v35, %v983_v22  ;;  %v303_v37 = vpop.f32.mrb[5].mxu0 }
  0xf9   : > { %v304_v38 = vadd.f32 %v983_v22, %v303_v37  ;;  %v1071_v39 = vpop.f32.mrb[6].mxu0 }
  0xfa   : > { %v996_v40 = vmul.f32 -1.442695, %v312_v36  ;;  %v315_v41 = vadd.f32 %v1071_v39, %v983_v22  ;;  %v306_v42 = vpop.f32.mrb[7].mxu0 }
  0xfb   : > { %v994_v43 = vmul.f32 -1.442695, %v304_v38  ;;  %v307_v44 = vadd.f32 %v983_v22, %v306_v42  ;;  %v1175_v22 = vld [vmem:[%s1600_s1 + $0x68] sm:$0xff]  }
  0xfc   : > { %1188 = vpow2.f32 %v996_v40  ;;  %v997_v45 = vmul.f32 -1.442695, %v315_v41  ;;  %1102 = vmatprep.subr.bf16.mxu0 %v1175_v22 }
  0xfd   : > { %1190 = vpow2.f32 %v994_v43  ;;  %v995_v46 = vmul.f32 -1.442695, %v307_v44  ;;  %1103 = vmatpush3.bf16.msra.mxu0 %v1175_v22 }
  0xfe   : > { %v1181_v47 = vpop.eup %1180  ;;  %1192 = vpow2.f32 %v997_v45  ;;  %1104 = vmatprep.subr.bf16.mxu0 %v1176_v23 }
  0xff   : > { %v1183_v48 = vpop.eup %1182  ;;  %v344_v49 = vadd.f32 1.0, %v1181_v47  ;;  %1194 = vpow2.f32 %v995_v46 }
 0x100   : > { %v1185_v50 = vpop.eup %1184  ;;  %v342_v51 = vadd.f32 1.0, %v1183_v48 }
 0x101   : > { %v1187_v52 = vpop.eup %1186  ;;  %1196 = vrcp.f32 %v344_v49  ;;  %v345_v53 = vadd.f32 1.0, %v1185_v50  ;;  %1105 = vmatpush3.bf16.msra.mxu0 %v1176_v23 }
 0x102   : > { %1198 = vrcp.f32 %v342_v51  ;;  %v343_v54 = vadd.f32 1.0, %v1187_v52 }
 0x103   : > { %1200 = vrcp.f32 %v345_v53 }
 0x104   : > { %1202 = vrcp.f32 %v343_v54 }
 0x106   : > { %v1189_v55 = vpop.eup %1188 }
 0x107   : > { %v1191_v56 = vpop.eup %1190  ;;  %v348_v57 = vadd.f32 1.0, %v1189_v55 }
 0x108   : > { %v1193_v58 = vpop.eup %1192  ;;  %v346_v59 = vadd.f32 1.0, %v1191_v56 }
 0x109   : > { %v1195_v60 = vpop.eup %1194  ;;  %1204 = vrcp.f32 %v348_v57  ;;  %v349_v61 = vadd.f32 1.0, %v1193_v58 }
 0x10a   : > { %1206 = vrcp.f32 %v346_v59  ;;  %v347_v62 = vadd.f32 1.0, %v1195_v60 }
 0x10b   : > { %v1197_v63 = vpop.eup %1196  ;;  %1208 = vrcp.f32 %v349_v61 }
 0x10c   : > { %v1199_v0 = vpop.eup %1198  ;;  %1210 = vrcp.f32 %v347_v62  ;;  %v368_v3 = vmul.f32 %v1197_v63, %v296_v24  ;;  %v1177_v24 = vld [vmem:[%s1600_s1 + $0x78] sm:$0xff]  }
 0x10d   : > { %v1201_v1 = vpop.eup %1200  ;;  %v366_v5 = vmul.f32 %v1199_v0, %v288_v26  ;;  %1106 = vmatprep.subr.bf16.mxu0 %v1177_v24  ;;  %v1179_v26 = vld [vmem:[%s1600_s1 + $0x88] sm:$0xff]  }
 0x10e   : > { %v1203_v2 = vpop.eup %1202  ;;  %v369_v4 = vmul.f32 %v1201_v1, %v299_v29  ;;  %1107 = vmatpush3.bf16.msra.mxu0 %v1177_v24  ;;  %v1015_v24 = vld [vmem:[%s1601_s2 + $0x2] ss:$0 sm:$0xff] }
 0x10f   : > { %v367_v6 = vmul.f32 %v1203_v2, %v291_v32  ;;  %1108 = vmatprep.subr.bf16.mxu0 %v1178_v25 }
 0x110   : > { %v375_v7 = vpack.c.bf16 %v369_v4, %v368_v3 }
 0x111   : > { %v374_v8 = vpack.c.bf16 %v367_v6, %v366_v5 }
 0x112   : > { %1109 = vmatpush3.bf16.msra.mxu0 %v1178_v25 }
 0x113   : > { %v1205_v9 = vpop.eup %1204  ;;  %1088 = vmatprep.mubr.bf16.mxu1 %v374_v8  ;;  %1110 = vmatprep.subr.bf16.mxu0 %v1179_v26 }
 0x114   : > { %v1207_v10 = vpop.eup %1206  ;;  %1089 = vmatmul.mubr.bf16.vlgmr.msra.gmra.mrb[0].mxu1 %v375_v7  ;;  %v372_v13 = vmul.f32 %v1205_v9, %v312_v36 }
 0x115   : > { %v1209_v11 = vpop.eup %1208  ;;  %v370_v15 = vmul.f32 %v1207_v10, %v304_v38 }
 0x116   : > { %v1211_v12 = vpop.eup %1210  ;;  %v373_v14 = vmul.f32 %v1209_v11, %v315_v41  ;;  %1111 = vmatpush3.bf16.msra.mxu0 %v1179_v26 }
 0x117   : > { %v371_v16 = vmul.f32 %v1211_v12, %v307_v44 }
 0x118   : > { %v377_v17 = vpack.c.bf16 %v373_v14, %v372_v13 }
 0x119   : > { %v376_v18 = vpack.c.bf16 %v371_v16, %v370_v15 }
 0x11b   : > { %1092 = vmatprep.mubr.bf16.mxu1 %v376_v18 }
 0x11c   : > { %1093 = vmatmul.mubr.bf16.gmra.mrb[4].mxu1 %v377_v17 }
 0x1e7   : > { %v1090_v28 = vpop.f32.mrb[0].mxu1 }
 0x1e8   : > { %v473_v29 = vadd.f32 %v1090_v28, %v998_v27  ;;  %v464_v30 = vpop.f32.mrb[1].mxu1 }
 0x1e9   : > { %v465_v31 = vadd.f32 %v998_v27, %v464_v30  ;;  %v1091_v32 = vpop.f32.mrb[2].mxu1 }
 0x1ea   : > { %v1009_v33 = vmul.f32 -1.442695, %v473_v29  ;;  %v476_v34 = vadd.f32 %v1091_v32, %v998_v27  ;;  %v467_v35 = vpop.f32.mrb[3].mxu1 }
 0x1eb   : > { %v1007_v36 = vmul.f32 -1.442695, %v465_v31  ;;  %v468_v37 = vadd.f32 %v998_v27, %v467_v35 }
 0x1ec   : > { %1212 = vpow2.f32 %v1009_v33  ;;  %v1010_v38 = vmul.f32 -1.442695, %v476_v34 }
 0x1ed   : > { %1214 = vpow2.f32 %v1007_v36  ;;  %v1008_v39 = vmul.f32 -1.442695, %v468_v37 }
 0x1ee   : > { %1216 = vpow2.f32 %v1010_v38 }
 0x1ef   : > { %1218 = vpow2.f32 %v1008_v39  ;;  %v1094_v40 = vpop.f32.mrb[4].mxu1 }
 0x1f0   : > { %v489_v41 = vadd.f32 %v1094_v40, %v998_v27  ;;  %v480_v42 = vpop.f32.mrb[5].mxu1 }
 0x1f1   : > { %v481_v43 = vadd.f32 %v998_v27, %v480_v42  ;;  %v1095_v44 = vpop.f32.mrb[6].mxu1 }
 0x1f2   : > { %v1013_v45 = vmul.f32 -1.442695, %v489_v41  ;;  %v492_v46 = vadd.f32 %v1095_v44, %v998_v27  ;;  %v483_v47 = vpop.f32.mrb[7].mxu1 }
 0x1f3   : > { %v1011_v48 = vmul.f32 -1.442695, %v481_v43  ;;  %v484_v49 = vadd.f32 %v998_v27, %v483_v47 }
 0x1f4   : > { %1220 = vpow2.f32 %v1013_v45  ;;  %v1014_v50 = vmul.f32 -1.442695, %v492_v46 }
 0x1f5   : > { %1222 = vpow2.f32 %v1011_v48  ;;  %v1012_v51 = vmul.f32 -1.442695, %v484_v49 }
 0x1f6   : > { %v1213_v52 = vpop.eup %1212  ;;  %1224 = vpow2.f32 %v1014_v50 }
 0x1f7   : > { %v1215_v53 = vpop.eup %1214  ;;  %v521_v54 = vadd.f32 1.0, %v1213_v52  ;;  %1226 = vpow2.f32 %v1012_v51 }
 0x1f8   : > { %v1217_v55 = vpop.eup %1216  ;;  %v519_v56 = vadd.f32 1.0, %v1215_v53 }
 0x1f9   : > { %v1219_v57 = vpop.eup %1218  ;;  %1228 = vrcp.f32 %v521_v54  ;;  %v522_v58 = vadd.f32 1.0, %v1217_v55 }
 0x1fa   : > { %1230 = vrcp.f32 %v519_v56  ;;  %v520_v59 = vadd.f32 1.0, %v1219_v57 }
 0x1fb   : > { %1232 = vrcp.f32 %v522_v58 }
 0x1fc   : > { %1234 = vrcp.f32 %v520_v59 }
 0x1fe   : > { %v1221_v60 = vpop.eup %1220 }
 0x1ff   : > { %v1223_v61 = vpop.eup %1222  ;;  %v525_v62 = vadd.f32 1.0, %v1221_v60 }
 0x200   : > { %v1225_v63 = vpop.eup %1224  ;;  %v523_v0 = vadd.f32 1.0, %v1223_v61 }
 0x201   : > { %v1227_v1 = vpop.eup %1226  ;;  %1236 = vrcp.f32 %v525_v62  ;;  %v526_v2 = vadd.f32 1.0, %v1225_v63 }
 0x202   : > { %1238 = vrcp.f32 %v523_v0  ;;  %v524_v3 = vadd.f32 1.0, %v1227_v1  ;;  %v712_v1 = vlaneseq }
 0x203   : > { %v1229_v4 = vpop.eup %1228  ;;  %1240 = vrcp.f32 %v526_v2 }
 0x204   : > { %v1231_v5 = vpop.eup %1230  ;;  %1242 = vrcp.f32 %v524_v3  ;;  %v545_v8 = vmul.f32 %v1229_v4, %v473_v29  ;;  %v1487_v2 = vand.u32 127, %v712_v1 }
 0x205   : > { %v1233_v6 = vpop.eup %1232  ;;  %v543_v10 = vmul.f32 %v1231_v5, %v465_v31 }
 0x206   : > { %v1235_v7 = vpop.eup %1234  ;;  %v546_v9 = vmul.f32 %v1233_v6, %v476_v34 }
 0x207   : > { %v544_v11 = vmul.f32 %v1235_v7, %v468_v37 }
 0x208   : > { %v552_v12 = vpack.c.bf16 %v546_v9, %v545_v8 }
 0x209   : > { %v551_v13 = vpack.c.bf16 %v544_v11, %v543_v10 }
 0x20b   : > { %v1237_v14 = vpop.eup %1236  ;;  %1112 = vmatprep.mubr.bf16.mxu0 %v551_v13 }
 0x20c   : > { %v1239_v15 = vpop.eup %1238  ;;  %1113 = vmatmul.mubr.bf16.vlgmr.msra.gmra.mrb[8].mxu0 %v552_v12  ;;  %v549_v18 = vmul.f32 %v1237_v14, %v489_v41 }
 0x20d   : > { %v1241_v16 = vpop.eup %1240  ;;  %v547_v20 = vmul.f32 %v1239_v15, %v481_v43 }
 0x20e   : > { %v1243_v17 = vpop.eup %1242  ;;  %v550_v19 = vmul.f32 %v1241_v16, %v492_v46 }
 0x20f   : > { %v548_v21 = vmul.f32 %v1243_v17, %v484_v49 }
 0x210   : > { %v554_v22 = vpack.c.bf16 %v550_v19, %v549_v18 }
 0x211   : > { %v553_v23 = vpack.c.bf16 %v548_v21, %v547_v20 }
 0x213   : > { %1116 = vmatprep.mubr.bf16.mxu0 %v553_v23 }
 0x214   : > { %1117 = vmatmul.mubr.bf16.gmra.mrb[12].mxu0 %v554_v22 }
 0x2df   : > { %v1114_v25 = vpop.f32.mrb[8].mxu0 }
 0x2e0   : > { %v1447_v26 = vadd.f32 %v1114_v25, %v1015_v24  ;;  %v641_v27 = vpop.f32.mrb[9].mxu0 }
 0x2e1   : > { %v1449_v28 = vadd.f32 %v1015_v24, %v641_v27  ;;  %v1115_v29 = vpop.f32.mrb[10].mxu0 }
 0x2e2   : > { %684 = vrot.lane.b32.xlu1 %v1447_v26, %s1308_s8  ;;  %v644_v30 = vpop.f32.mrb[11].mxu0  ;;  %v1453_v31 = vadd.f32 %v1115_v29, %v1015_v24 }
 0x2e3   : > { %680 = vrot.lane.b32.xlu0 %v1449_v28, %s1308_s8  ;;  %v1455_v32 = vadd.f32 %v1015_v24, %v644_v30 }
 0x2e6   : > { %686 = vrot.lane.b32.xlu1 %v1453_v31, %s1308_s8 }
 0x2e7   : > { %v1118_v33 = vpop.f32.mrb[12].mxu0  ;;  %682 = vrot.lane.b32.xlu0 %v1455_v32, %s1308_s8 }
 0x2e8   : > { %v657_v34 = vpop.f32.mrb[13].mxu0  ;;  %v1464_v39 = vadd.f32 %v1118_v33, %v1015_v24 }
 0x2e9   : > { %v1459_v35 = vadd.f32 %v1015_v24, %v657_v34  ;;  %v1119_v36 = vpop.f32.mrb[14].mxu0 }
 0x2ea   : > { %v660_v37 = vpop.f32.mrb[15].mxu0  ;;  %v1467_v40 = vadd.f32 %v1119_v36, %v1015_v24 }
 0x2eb   : > { %v1461_v38 = vadd.f32 %v1015_v24, %v660_v37  ;;  %688 = vrot.lane.b32.xlu0 %v1459_v35, %s1308_s8 }
 0x2ed   : > { %690 = vrot.lane.b32.xlu1 %v1461_v38, %s1308_s8 }
 0x2ef   : > { %692 = vrot.lane.b32.xlu0 %v1464_v39, %s1308_s8 }
 0x2f1   : > { %694 = vrot.lane.b32.xlu1 %v1467_v40, %s1308_s8 }
 0x354   : > { %v685_v41 = vpop.permute.xlu1 %684 }
 0x355   : > { %v706_v42 = vadd.f32 %v685_v41, %v1447_v26  ;;  %v681_v43 = vpop.permute.xlu0 %680 }
 0x356   : > { %v704_v44 = vadd.f32 %v681_v43, %v1449_v28 }
 0x357   : > { %v721_v45 = vsel %vm714_vm1, %v706_v42, -inf }
 0x358   : > { %v687_v46 = vpop.permute.xlu1 %686  ;;  %722 = vmax.xlane.f32.xlu0 %v721_v45  ;;  %v715_v50 = vsel %vm714_vm1, %v704_v44, -inf }
 0x359   : > { %v683_v47 = vpop.permute.xlu0 %682  ;;  %v707_v49 = vadd.f32 %v687_v46, %v1453_v31 }
 0x35a   : > { %v705_v48 = vadd.f32 %v683_v47, %v1455_v32 }
 0x35b   : > { %v724_v55 = vsel %vm714_vm1, %v707_v49, -inf }
 0x35c   : > { %716 = vmax.xlane.f32.xlu0 %v715_v50  ;;  %v718_v51 = vsel %vm714_vm1, %v705_v48, -inf }
 0x35d   : > { %719 = vmax.xlane.f32.xlu1 %v718_v51  ;;  %v689_v52 = vpop.permute.xlu0 %688 }
 0x35e   : > { %v708_v53 = vadd.f32 %v689_v52, %v1459_v35 }
 0x35f   : > { %v691_v54 = vpop.permute.xlu1 %690 }
 0x360   : > { %v709_v56 = vadd.f32 %v691_v54, %v1461_v38  ;;  %725 = vmax.xlane.f32.xlu0 %v724_v55  ;;  %v727_v57 = vsel %vm714_vm1, %v708_v53, -inf }
 0x361   : > { %728 = vmax.xlane.f32.xlu1 %v727_v57  ;;  %v693_v58 = vpop.permute.xlu0 %692 }
 0x362   : > { %v710_v59 = vadd.f32 %v693_v58, %v1464_v39  ;;  %v730_v60 = vsel %vm714_vm1, %v709_v56, -inf }
 0x363   : > { %v695_v61 = vpop.permute.xlu1 %694 }
 0x364   : > { %v711_v62 = vadd.f32 %v695_v61, %v1467_v40  ;;  %731 = vmax.xlane.f32.xlu0 %v730_v60  ;;  %v733_v63 = vsel %vm714_vm1, %v710_v59, -inf }
 0x365   : > { %734 = vmax.xlane.f32.xlu1 %v733_v63 }
 0x366   : > { %v736_v0 = vsel %vm714_vm1, %v711_v62, -inf }
 0x368   : > { %737 = vmax.xlane.f32.xlu0 %v736_v0 }
 0x3e5   : > { %v723_v3 = vpop.xlane.xlu0 %722 }
 0x3e6   : > { %vm741_vm2 = vcmp.eq.f32.partialorder %v706_v42, %v723_v3 }
 0x3e7   : > { %v749_v4 = vsel %vm741_vm2, %v1487_v2, 5  ;;  %vm875_vm2 = vcmp.eq.s32.totalorder %v1487_v2, 10 }
 0x3e8   : > { %v785_v5 = vsel %vm714_vm1, %v749_v4, 2147483647 }
 0x3e9   : > { %v717_v6 = vpop.xlane.xlu0 %716  ;;  %v787_v7 = vshra.s32 %v785_v5, 16  ;;  %v786_v51 = vand.u32 65535, %v785_v5 }
 0x3ea   : > { %vm739_vm3 = vcmp.eq.f32.partialorder %v704_v44, %v717_v6  ;;  %v720_v8 = vpop.xlane.xlu1 %719 }
 0x3eb   : > { %v747_v9 = vsel %vm739_vm3, %v1487_v2, 5  ;;  %vm740_vm4 = vcmp.eq.f32.partialorder %v705_v48, %v720_v8  ;;  %v789_v10 = vcvt.s32.f32 %v787_v7 }
 0x3ec   : > { %v755_v11 = vsel %vm714_vm1, %v747_v9, 2147483647  ;;  %v748_v12 = vsel %vm740_vm4, %v1487_v2, 5 }
 0x3ed   : > { %790 = vmin.xlane.f32.xlu1 %v789_v10  ;;  %v726_v13 = vpop.xlane.xlu0 %725  ;;  %v757_v14 = vshra.s32 %v755_v11, 16  ;;  %v770_v18 = vsel %vm714_vm1, %v748_v12, 2147483647  ;;  %v756_v54 = vand.u32 65535, %v755_v11 }
 0x3ee   : > { %vm742_vm5 = vcmp.eq.f32.partialorder %v707_v49, %v726_v13  ;;  %v729_v15 = vpop.xlane.xlu1 %728  ;;  %v772_v30 = vshra.s32 %v770_v18, 16  ;;  %v771_v63 = vand.u32 65535, %v770_v18 }
 0x3ef   : > { %v750_v16 = vsel %vm742_vm5, %v1487_v2, 5  ;;  %vm743_vm6 = vcmp.eq.f32.partialorder %v708_v53, %v729_v15  ;;  %v759_v17 = vcvt.s32.f32 %v757_v14  ;;  %v788_v53 = vcvt.s32.f32 %v786_v51 }
 0x3f0   : > { %v800_v19 = vsel %vm714_vm1, %v750_v16, 2147483647  ;;  %v751_v20 = vsel %vm743_vm6, %v1487_v2, 5  ;;  %v774_v44 = vcvt.s32.f32 %v772_v30  ;;  %v758_v57 = vcvt.s32.f32 %v756_v54 }
 0x3f1   : > { %v815_v21 = vsel %vm714_vm1, %v751_v20, 2147483647  ;;  %760 = vmin.xlane.f32.xlu1 %v759_v17  ;;  %v732_v22 = vpop.xlane.xlu0 %731  ;;  %v802_v23 = vshra.s32 %v800_v19, 16  ;;  %v801_v58 = vand.u32 65535, %v800_v19  ;;  %v773_v7 = vcvt.s32.f32 %v771_v63 }
 0x3f2   : > { %vm744_vm7 = vcmp.eq.f32.partialorder %v709_v56, %v732_v22  ;;  %v735_v24 = vpop.xlane.xlu1 %734  ;;  %v817_v25 = vshra.s32 %v815_v21, 16 }
 0x3f3   : > { %v752_v27 = vsel %vm744_vm7, %v1487_v2, 5  ;;  %vm745_vm8 = vcmp.eq.f32.partialorder %v710_v59, %v735_v24  ;;  %v804_v29 = vcvt.s32.f32 %v802_v23  ;;  %v816_v59 = vand.u32 65535, %v815_v21 }
 0x3f4   : > { %v830_v33 = vsel %vm714_vm1, %v752_v27, 2147483647  ;;  %v753_v34 = vsel %vm745_vm8, %v1487_v2, 5  ;;  %v819_v36 = vcvt.s32.f32 %v817_v25 }
 0x3f5   : > { %v845_v37 = vsel %vm714_vm1, %v753_v34, 2147483647  ;;  %805 = vmin.xlane.f32.xlu0 %v804_v29  ;;  %v738_v41 = vpop.xlane.xlu0 %737  ;;  %v832_v45 = vshra.s32 %v830_v33, 16  ;;  %v818_v1 = vcvt.s32.f32 %v816_v59  ;;  %v831_v8 = vand.u32 65535, %v830_v33 }
 0x3f6   : > { %vm746_vm9 = vcmp.eq.f32.partialorder %v711_v62, %v738_v41  ;;  %820 = vmin.xlane.f32.xlu1 %v819_v36  ;;  %v847_v42 = vshra.s32 %v845_v37, 16  ;;  %v803_v62 = vcvt.s32.f32 %v801_v58  ;;  %v846_v3 = vand.u32 65535, %v845_v37 }
 0x3f7   : > { %v754_v43 = vsel %vm746_vm9, %v1487_v2, 5  ;;  %v834_v48 = vcvt.s32.f32 %v832_v45  ;;  %v833_v14 = vcvt.s32.f32 %v831_v8 }
 0x3f8   : > { %v860_v46 = vsel %vm714_vm1, %v754_v43, 2147483647  ;;  %v849_v47 = vcvt.s32.f32 %v847_v42 }
 0x3f9   : > { %775 = vmin.xlane.f32.xlu0 %v774_v44  ;;  %v862_v49 = vshra.s32 %v860_v46, 16  ;;  %v861_v15 = vand.u32 65535, %v860_v46 }
 0x3fa   : > { %850 = vmin.xlane.f32.xlu1 %v849_v47 }
 0x3fb   : > { %v864_v50 = vcvt.s32.f32 %v862_v49  ;;  %v863_v18 = vcvt.s32.f32 %v861_v15 }
 0x3fd   : > { %835 = vmin.xlane.f32.xlu0 %v834_v48 }
 0x401   : > { %865 = vmin.xlane.f32.xlu0 %v864_v50 }
 0x47a   : > { %v791_v52 = vpop.xlane.xlu1 %790 }
 0x47b   : > { %vm792_vm10 = vcmp.eq.f32.partialorder %v789_v10, %v791_v52  ;;  %v848_v10 = vcvt.s32.f32 %v846_v3  ;;  %v797_v20 = vcvt.f32.s32 %v791_v52 }
 0x47c   : > { %v793_v55 = vsel %vm792_vm10, %v788_v53, inf }
 0x47d   : > { %794 = vmin.xlane.f32.xlu1 %v793_v55  ;;  %v798_v22 = vshll.u32 %v797_v20, 16 }
 0x47e   : > { %v761_v56 = vpop.xlane.xlu1 %760 }
 0x47f   : > { %vm762_vm11 = vcmp.eq.f32.partialorder %v759_v17, %v761_v56  ;;  %v767_v23 = vcvt.f32.s32 %v761_v56 }
 0x480   : > { %v763_v60 = vsel %vm762_vm11, %v758_v57, inf }
 0x481   : > { %764 = vmin.xlane.f32.xlu1 %v763_v60 }
 0x482   : > { %v806_v61 = vpop.xlane.xlu0 %805 }
 0x483   : > { %v821_v0 = vpop.xlane.xlu1 %820  ;;  %vm807_vm12 = vcmp.eq.f32.partialorder %v804_v29, %v806_v61  ;;  %v768_v29 = vshll.u32 %v767_v23, 16  ;;  %v812_v30 = vcvt.f32.s32 %v806_v61 }
 0x484   : > { %v808_v4 = vsel %vm807_vm12, %v803_v62, inf  ;;  %vm822_vm13 = vcmp.eq.f32.partialorder %v819_v36, %v821_v0  ;;  %v827_v36 = vcvt.f32.s32 %v821_v0 }
 0x485   : > { %809 = vmin.xlane.f32.xlu0 %v808_v4  ;;  %v823_v5 = vsel %vm822_vm13, %v818_v1, inf  ;;  %v813_v43 = vshll.u32 %v812_v30, 16 }
 0x486   : > { %824 = vmin.xlane.f32.xlu1 %v823_v5  ;;  %v776_v6 = vpop.xlane.xlu0 %775 }
 0x487   : > { %v851_v9 = vpop.xlane.xlu1 %850  ;;  %vm777_vm14 = vcmp.eq.f32.partialorder %v774_v44, %v776_v6  ;;  %v782_v44 = vcvt.f32.s32 %v776_v6 }
 0x488   : > { %v778_v11 = vsel %vm777_vm14, %v773_v7, inf  ;;  %vm852_vm15 = vcmp.eq.f32.partialorder %v849_v47, %v851_v9  ;;  %v857_v49 = vcvt.f32.s32 %v851_v9 }
 0x489   : > { %779 = vmin.xlane.f32.xlu0 %v778_v11  ;;  %v853_v12 = vsel %vm852_vm15, %v848_v10, inf  ;;  %v783_v54 = vshll.u32 %v782_v44, 16 }
 0x48a   : > { %854 = vmin.xlane.f32.xlu1 %v853_v12  ;;  %v836_v13 = vpop.xlane.xlu0 %835  ;;  %v858_v59 = vshll.u32 %v857_v49, 16 }
 0x48b   : > { %vm837_vm0 = vcmp.eq.f32.partialorder %v834_v48, %v836_v13  ;;  %v828_v48 = vshll.u32 %v827_v36, 16  ;;  %v842_v55 = vcvt.f32.s32 %v836_v13 }
 0x48c   : > { %v838_v16 = vsel %vm837_vm0, %v833_v14, inf }
 0x48d   : > { %839 = vmin.xlane.f32.xlu0 %v838_v16  ;;  %v843_v3 = vshll.u32 %v842_v55, 16 }
 0x48e   : > { %v1505_v17 = vpop.xlane.xlu0 %865 }
 0x48f   : > { %vm867_vm1 = vcmp.eq.f32.partialorder %v864_v50, %v1505_v17  ;;  %v872_v4 = vcvt.f32.s32 %v1505_v17 }
 0x490   : > { %v868_v19 = vsel %vm867_vm1, %v863_v18, inf }
 0x491   : > { %869 = vmin.xlane.f32.xlu0 %v868_v19  ;;  %v873_v10 = vshll.u32 %v872_v4, 16 }
 0x50a   : > { %v795_v21 = vpop.xlane.xlu1 %794 }
 0x50b   : > { %v796_v24 = vcvt.f32.s32 %v795_v21 }
 0x50d   : > { %v799_v25 = vadd.s32 %v798_v22, %v796_v24 }
 0x50e   : > { %v765_v27 = vpop.xlane.xlu1 %764 }
 0x50f   : > { %v878_v33 = vcvt.s32.f32 %v799_v25  ;;  %v766_v34 = vcvt.f32.s32 %v765_v27 }
 0x511   : > { %v886_v37 = vsel %vm875_vm2, %v878_v33, %v1447_v26  ;;  %v769_v41 = vadd.s32 %v768_v29, %v766_v34 }
 0x512   : > { %894 = vst [vmem:[%s1515_s11 + $0x10] sm:$0xff] %v886_v37  ;;  %v810_v42 = vpop.xlane.xlu0 %809 }
 0x513   : > { %v876_v45 = vcvt.s32.f32 %v769_v41  ;;  %v811_v46 = vcvt.f32.s32 %v810_v42  ;;  %v825_v47 = vpop.xlane.xlu1 %824 }
 0x514   : > { %v826_v50 = vcvt.f32.s32 %v825_v47 }
 0x515   : > { %v884_v26 = vsel %vm875_vm2, %v876_v45, %v1449_v28  ;;  %v814_v51 = vadd.s32 %v813_v43, %v811_v46 }
 0x516   : > { %892 = vst [vmem:[%s1515_s11] sm:$0xff] %v884_v26  ;;  %v829_v52 = vadd.s32 %v828_v48, %v826_v50  ;;  %v780_v53 = vpop.xlane.xlu0 %779 }
 0x517   : > { %v879_v56 = vcvt.s32.f32 %v814_v51  ;;  %v781_v57 = vcvt.f32.s32 %v780_v53  ;;  %v855_v58 = vpop.xlane.xlu1 %854 }
 0x518   : > { %v880_v60 = vcvt.s32.f32 %v829_v52  ;;  %v856_v61 = vcvt.f32.s32 %v855_v58 }
 0x519   : > { %v887_v62 = vsel %vm875_vm2, %v879_v56, %v1453_v31  ;;  %v784_v63 = vadd.s32 %v783_v54, %v781_v57 }
 0x51a   : > { %895 = vst [vmem:[%s1515_s11 + $0x18] sm:$0xff] %v887_v62  ;;  %v888_v28 = vsel %vm875_vm2, %v880_v60, %v1459_v35  ;;  %v859_v0 = vadd.s32 %v858_v59, %v856_v61  ;;  %v840_v1 = vpop.xlane.xlu0 %839 }
 0x51b   : > { %896 = vst [vmem:[%s1515_s11 + $0x20] sm:$0xff] %v888_v28  ;;  %v877_v5 = vcvt.s32.f32 %v784_v63  ;;  %v841_v6 = vcvt.f32.s32 %v840_v1 }
 0x51c   : > { %v882_v7 = vcvt.s32.f32 %v859_v0 }
 0x51d   : > { %v885_v31 = vsel %vm875_vm2, %v877_v5, %v1455_v32  ;;  %v844_v8 = vadd.s32 %v843_v3, %v841_v6 }
 0x51e   : > { %893 = vst [vmem:[%s1515_s11 + $0x8] sm:$0xff] %v885_v31  ;;  %v890_v35 = vsel %vm875_vm2, %v882_v7, %v1464_v39  ;;  %v870_v9 = vpop.xlane.xlu0 %869 }
 0x51f   : > { %898 = vst [vmem:[%s1515_s11 + $0x30] sm:$0xff] %v890_v35  ;;  %v881_v11 = vcvt.s32.f32 %v844_v8  ;;  %v871_v12 = vcvt.f32.s32 %v870_v9 }
 0x521   : > { %v889_v32 = vsel %vm875_vm2, %v881_v11, %v1461_v38  ;;  %v874_v13 = vadd.s32 %v873_v10, %v871_v12 }
 0x522   : > { %897 = vst [vmem:[%s1515_s11 + $0x28] sm:$0xff] %v889_v32 }
 0x523   : > { %v883_v14 = vcvt.s32.f32 %v874_v13 }
 0x525   : > { %v891_v39 = vsel %vm875_vm2, %v883_v14, %v1467_v40 }
 0x526   : > { %899 = vst [vmem:[%s1515_s11 + $0x38] sm:$0xff] %v891_v39 }
 0x527   : > { %1257 = shalt.err (!%p1254_p3)
}
 0x528   : > { %s1258_s30 = scalar_lea.hbm %s1548_s25, 1024  ;;  %s1262_s6 = scalar_lea.hbm %s1602_s3, 2048 }
 0x529   : > { %p1259_p4 = scmp.ne.s32.totalorder %s1548_s25, %s1258_s30  ;;  %p1263_p9 = scmp.lt.u32.totalorder %s1548_s25, %s1602_s3 }
 0x52a   : > { %p1264_p10 = scmp.lt.u32.totalorder %s1262_s6, %s1258_s30  ;;  %p1266_p12 = scmp.lt.u32.totalorder %s1258_s30, %s1548_s25 }
 0x52b   : > { %p1260_p7 = pnand %p1259_p4, %p1370_p5 }
 0x52c   : > { %p1265_p11 = por %p1264_p10, %p1263_p9 }
 0x52d   : > { %p1261_p8 = pneg %p1260_p7 }
 0x52e   : > { %p1267_p13 = por %p1266_p12, %p1265_p11 }
 0x530   : > { %p1268_p0 = pnand %p1267_p13, %p1261_p8 }
 0x532   : > { %1271 = shalt.err (!%p1268_p0)
}
 0x533   : > { %s1310_s9 = smov 128   ;;  %s1311_s10 = smov 8  }
 0x534   : > { %1120 = dma.vmem_to_hbm [thread:$0]  (%p1370_p5), %s1550_s19, 1024, %s1548_s25, %s1558_s16, %s1310_s9, %s1310_s9, %s1311_s10  }
 0x535 PF: > { %p1126_p1 = scmp.ge.s32.totalorder %s1306_s15, 2  ;;  %s929_s11 = sand.u32 1, %s1294_s12  }
 0x536   : > { %s930_s17 = scalar_lea.sflag [#allocation3], %s929_s11 }
 0x537   : > { %p1123_p2 = pnand %p1126_p1, %p1374_p6 }
 0x539   : > { %1289 = dma.done.wait (!%p1123_p2), %s930_s17, 1024  }
 0x53a   : > { %1291 = vsyncadd (!%p1123_p2), %s930_s17, 4294966272  ;;  %p13_p3 = scmp.ge.s32.totalorder %s1357_s18, 4   ;;  %s1605_s12 = smov %s1298_s13 }
 0x53b   : > { %s1606_s13 = smov %s1302_s14  ;;  %s1607_s14 = smov %s1368_s21 }
 0x53c   : > { %s1608_s15 = smov %s1357_s18  ;;  %15 = sbr.rel (!%p13_p3) target bundleno = 3 (0x3), region = 67 }
 0x543   :  { %935 = vsyncpa [#allocation3], 1 }
 0x544   :  { %937 = vsyncpa [#allocation3 + $0x1], 1 }

</bundles_post_ra>
